<compile_context>
chip_gen: v7x
topology: tpu7x:2x2x1
jax: 0.10.0
libtpu: 0.0.40
codegen_flags: <defaults>
</compile_context>

<pallas_src>
import functools

import jax
import jax.numpy as jnp
from jax.experimental import pallas as pl
from jax.experimental.pallas import tpu as pltpu


def _round_up(a, b):
    return -(-a // b) * b


def _groupnorm_kernel(x_ref, wb_ref, o_ref, *, eps, n_elems, s_rows, hw,
                      needs_mask):
    # x_ref:  (TB, R, L) -- TB normalization groups, each flattened lane-dense.
    # wb_ref: (TB, R, 2) -- per-row [weight, bias] (channel value repeated).
    TB, R, L = x_ref.shape

    # ---- Pass 1: mean.  Padded spatial entries are zero, so a plain sum is
    # exact.  Reduce sublane axis first (VPU adds), then one lane reduce.
    x1 = x_ref[...].astype(jnp.float32)
    part1 = jnp.sum(x1, axis=1, keepdims=True)          # (TB, 1, L)  VPU
    s1 = jnp.sum(part1, axis=2, keepdims=True)          # (TB, 1, 1)  one XLU
    mean = s1 * (1.0 / n_elems)

    # ---- Pass 2: centered (two-pass) variance; mask out spatial padding.
    x2 = x_ref[...].astype(jnp.float32)                 # fresh load (no spill)
    d = x2 - mean
    if needs_mask:
        row = jax.lax.broadcasted_iota(jnp.int32, (R, L), 0)
        lane = jax.lax.broadcasted_iota(jnp.int32, (R, L), 1)
        valid = ((row % s_rows) * L + lane) < hw
        d = jnp.where(valid[None], d, 0.0)
    part2 = jnp.sum(d * d, axis=1, keepdims=True)       # (TB, 1, L)  VPU
    css = jnp.sum(part2, axis=2, keepdims=True)         # (TB, 1, 1)  one XLU
    # Unbiased variance (ddof=1): matches torch.Tensor.var() used by the module.
    var = jnp.maximum(css, 0.0) * (1.0 / (n_elems - 1))
    inv_std = jax.lax.rsqrt(var + eps)                  # (TB, 1, 1)

    # Fold normalization + affine into a single per-row scale/shift (tiny).
    wb = wb_ref[...].astype(jnp.float32)
    w = wb[:, :, 0:1]                                   # (TB, R, 1)
    b = wb[:, :, 1:2]                                   # (TB, R, 1)
    scale = w * inv_std
    shift = b - mean * scale

    # ---- Pass 3: normalize + affine.  Fresh load keeps live ranges short.
    x3 = x_ref[...].astype(jnp.float32)
    o_ref[...] = (x3 * scale + shift).astype(o_ref.dtype)


def _pick_block_groups(ng, per_group_bytes, vmem_budget_bytes):
    """Largest divisor TB of `ng` whose double-buffered footprint fits the
    budget, preferring an even grid of >= 4 steps (>= 2 per TensorCore on
    v7x), then >= 2 steps (pipelining), then anything that fits."""
    divisors = [d for d in range(1, ng + 1) if ng % d == 0]
    fits = [d for d in divisors if 2 * d * per_group_bytes <= vmem_budget_bytes]
    fits = fits or [1]
    pref4 = [d for d in fits if ng // d >= 4 and (ng // d) % 2 == 0]
    pref2 = [d for d in fits if ng // d >= 2]
    for cands in (pref4, pref2, fits):
        if cands:
            return max(cands)
    return 1


def group_norm(x, weight, bias, *, num_groups, eps=1e-5,
               vmem_budget_bytes=40 * 1024 * 1024):
    """x: (N, C, H, W); weight/bias: (1, C, 1, 1).  Returns (N, C, H, W)."""
    N, C, H, W = x.shape
    G = num_groups
    assert C % G == 0
    Cg = C // G
    HW = H * W
    n_elems = Cg * HW
    assert n_elems > 1, "need >1 element per group for unbiased variance"
    NG = N * G

    # Lane-dense layout: each channel's spatial dim is padded up to a multiple
    # of 128 lanes; each group becomes an (R, 128) slab (pure reshape when no
    # padding is needed).
    LANES = 128
    S = _round_up(HW, LANES) // LANES      # rows per channel
    HWp = S * LANES
    R = Cg * S
    needs_pad = HWp != HW

    xr = x.reshape(N, C, HW)
    if needs_pad:
        # TODO(synk): the wrapper-side pad/slice costs ~2 extra HBM passes; a
        # fused lane-dense repack (per-element gamma/beta map or masked DMA)
        # would avoid it for HW % 128 != 0 shapes (7x7, 14x14, ...).
        xr = jnp.pad(xr, ((0, 0), (0, 0), (0, HWp - HW)))
    x_r = xr.reshape(NG, R, LANES)

    # Per-row affine params aligned with the (R, 128) layout: row r of a group
    # belongs to channel r // S.  Packed as a single (NG, R, 2) array so only
    # one lane-padded VMEM tile is needed per block.
    w_rows = jnp.repeat(weight.reshape(G, Cg).astype(jnp.float32), S, axis=-1)
    b_rows = jnp.repeat(bias.reshape(G, Cg).astype(jnp.float32), S, axis=-1)
    wb = jnp.stack([w_rows, b_rows], axis=-1)                    # (G, R, 2)
    wb = jnp.broadcast_to(wb[None], (N, G, R, 2)).reshape(NG, R, 2)

    # Real per-group VMEM footprint, including lane/sublane padding of the
    # affine tile (its (R, 2) slab pads to (round_up(R), 128) in VMEM).
    itemsize = x.dtype.itemsize
    sub = max(8, 32 // itemsize)                       # sublane packing
    in_pg = _round_up(R, sub) * LANES * itemsize
    out_pg = in_pg
    wb_pg = _round_up(R, 8) * LANES * 4
    per_group_bytes = in_pg + out_pg + wb_pg

    TB = _pick_block_groups(NG, per_group_bytes, vmem_budget_bytes)
    footprint = 2 * TB * per_group_bytes               # double-buffered
    vmem_limit = max(32 * 1024 * 1024, footprint + 8 * 1024 * 1024)
    # TODO(synk): add an HW-chunked two-pass path (second 'arbitrary' grid axis
    # accumulating sum/sumsq with pl.when init/finalize) for groups too large
    # to keep resident in VMEM (matters most on v7x's 64 MiB VMEM).

    grid = (NG // TB,)
    kernel = functools.partial(_groupnorm_kernel, eps=eps, n_elems=n_elems,
                               s_rows=S, hw=HW, needs_mask=needs_pad)

    out = pl.pallas_call(
        kernel,
        out_shape=jax.ShapeDtypeStruct((NG, R, LANES), x.dtype),
        grid_spec=pltpu.PrefetchScalarGridSpec(
            num_scalar_prefetch=0,
            grid=grid,
            in_specs=[
                pl.BlockSpec((TB, R, LANES), lambda i: (i, 0, 0)),
                pl.BlockSpec((TB, R, 2), lambda i: (i, 0, 0)),
            ],
            out_specs=pl.BlockSpec((TB, R, LANES), lambda i: (i, 0, 0)),
        ),
        compiler_params=pltpu.CompilerParams(
            dimension_semantics=("parallel",),
            vmem_limit_bytes=int(vmem_limit),
        ),
    )(x_r, wb)

    out = out.reshape(N, C, HWp)
    if needs_pad:
        out = out[..., :HW]
    return out.reshape(N, C, H, W)


def group_norm_ref(x, weight, bias, *, num_groups, eps=1e-5):
    """Pure-JAX reference mirroring the PyTorch module (unbiased variance)."""
    N, C, H, W = x.shape
    G = num_groups
    xr = x.reshape(N, G, -1).astype(jnp.float32)
    mean = xr.mean(-1, keepdims=True)
    var = xr.var(-1, keepdims=True, ddof=1)  # torch .var() default is unbiased
    xr = (xr - mean) / jnp.sqrt(var + eps)
    xr = xr.reshape(N, C, H, W)
    return xr * weight + bias


if __name__ == "__main__":
    key = jax.random.PRNGKey(0)

    N, C, H, W = 2, 4, 16, 16
    num_groups = 2  # C % G == 0 (default 32 would not divide C=4)

    kx, kw, kb = jax.random.split(key, 3)
    x = jax.random.normal(kx, (N, C, H, W), dtype=jnp.float32)

    # Module inits weight=1, bias=0; perturb deterministically so the affine
    # path is actually exercised.
    weight = jnp.ones((1, C, 1, 1), jnp.float32) + 0.1 * jax.random.normal(
        kw, (1, C, 1, 1), dtype=jnp.float32
    )
    bias = jnp.zeros((1, C, 1, 1), jnp.float32) + 0.1 * jax.random.normal(
        kb, (1, C, 1, 1), dtype=jnp.float32
    )

    out = group_norm(x, weight, bias, num_groups=num_groups, eps=1e-5)
    out = jax.block_until_ready(out)

    ref = group_norm_ref(x, weight, bias, num_groups=num_groups, eps=1e-5)
    assert out.shape == (N, C, H, W)
    assert jnp.allclose(out, ref, atol=1e-5, rtol=1e-5)

    print("KERNEL_OK")
</pallas_src>

<mosaic_0001>
module attributes {stable_mosaic.version = 11 : i64} {
  func.func @_groupnorm_kernel(%arg0: i32, %arg1: memref<1x4x128xf32, #tpu.memory_space<vmem>>, %arg2: memref<1x4x2xf32, #tpu.memory_space<vmem>>, %arg3: memref<1x4x128xf32, #tpu.memory_space<vmem>>) attributes {dimension_semantics = [#tpu.dimension_semantics<parallel>], iteration_bounds = array<i64: 4>, scalar_prefetch = 0 : i64, scratch_operands = 0 : i64, tpu.core_type = #tpu.core_type<tc>, window_params = [{transform_indices = @transform_0, window_bounds = array<i64: 1, 4, 128>}, {transform_indices = @transform_1, window_bounds = array<i64: 1, 4, 2>}, {transform_indices = @transform_2, window_bounds = array<i64: 1, 4, 128>}]} {
    %c0 = arith.constant 0 : index
    %c0_0 = arith.constant 0 : index
    %c0_1 = arith.constant 0 : index
    %0 = vector.load %arg1[%c0, %c0_0, %c0_1] : memref<1x4x128xf32, #tpu.memory_space<vmem>>, vector<1x4x128xf32>
    %cst = arith.constant dense<0.000000e+00> : vector<1x128xf32>
    %1 = vector.multi_reduction <add>, %0, %cst [1] : vector<1x4x128xf32> to vector<1x128xf32>
    %2 = vector.shape_cast %1 : vector<1x128xf32> to vector<1x1x128xf32>
    %cst_2 = arith.constant dense<0.000000e+00> : vector<1x1xf32>
    %3 = vector.multi_reduction <add>, %2, %cst_2 [2] : vector<1x1x128xf32> to vector<1x1xf32>
    %4 = vector.shape_cast %3 : vector<1x1xf32> to vector<1x1x1xf32>
    %cst_3 = arith.constant 0.001953125 : f32
    %5 = vector.broadcast %cst_3 : f32 to vector<1x1x1xf32>
    %6 = arith.mulf %4, %5 : vector<1x1x1xf32>
    %c0_4 = arith.constant 0 : index
    %c0_5 = arith.constant 0 : index
    %c0_6 = arith.constant 0 : index
    %7 = vector.load %arg1[%c0_4, %c0_5, %c0_6] : memref<1x4x128xf32, #tpu.memory_space<vmem>>, vector<1x4x128xf32>
    %8 = vector.broadcast %6 : vector<1x1x1xf32> to vector<1x4x128xf32>
    %9 = arith.subf %7, %8 : vector<1x4x128xf32>
    %10 = arith.mulf %9, %9 : vector<1x4x128xf32>
    %cst_7 = arith.constant dense<0.000000e+00> : vector<1x128xf32>
    %11 = vector.multi_reduction <add>, %10, %cst_7 [1] : vector<1x4x128xf32> to vector<1x128xf32>
    %12 = vector.shape_cast %11 : vector<1x128xf32> to vector<1x1x128xf32>
    %cst_8 = arith.constant dense<0.000000e+00> : vector<1x1xf32>
    %13 = vector.multi_reduction <add>, %12, %cst_8 [2] : vector<1x1x128xf32> to vector<1x1xf32>
    %14 = vector.shape_cast %13 : vector<1x1xf32> to vector<1x1x1xf32>
    %cst_9 = arith.constant 0.000000e+00 : f32
    %15 = vector.broadcast %cst_9 : f32 to vector<1x1x1xf32>
    %16 = arith.maximumf %14, %15 : vector<1x1x1xf32>
    %cst_10 = arith.constant 0.00195694715 : f32
    %17 = vector.broadcast %cst_10 : f32 to vector<1x1x1xf32>
    %18 = arith.mulf %16, %17 : vector<1x1x1xf32>
    %cst_11 = arith.constant 9.99999974E-6 : f32
    %19 = vector.broadcast %cst_11 : f32 to vector<1x1x1xf32>
    %20 = arith.addf %18, %19 : vector<1x1x1xf32>
    %21 = math.rsqrt %20 : vector<1x1x1xf32>
    %c0_12 = arith.constant 0 : index
    %c0_13 = arith.constant 0 : index
    %c0_14 = arith.constant 0 : index
    %22 = vector.load %arg2[%c0_12, %c0_13, %c0_14] : memref<1x4x2xf32, #tpu.memory_space<vmem>>, vector<1x4x2xf32>
    %23 = vector.extract_strided_slice %22 {offsets = [0, 0, 0], sizes = [1, 4, 1], strides = [1, 1, 1]} : vector<1x4x2xf32> to vector<1x4x1xf32>
    %24 = vector.extract_strided_slice %22 {offsets = [0, 0, 1], sizes = [1, 4, 1], strides = [1, 1, 1]} : vector<1x4x2xf32> to vector<1x4x1xf32>
    %25 = vector.broadcast %21 : vector<1x1x1xf32> to vector<1x4x1xf32>
    %26 = arith.mulf %23, %25 : vector<1x4x1xf32>
    %27 = vector.broadcast %6 : vector<1x1x1xf32> to vector<1x4x1xf32>
    %28 = arith.mulf %27, %26 : vector<1x4x1xf32>
    %29 = arith.subf %24, %28 : vector<1x4x1xf32>
    %c0_15 = arith.constant 0 : index
    %c0_16 = arith.constant 0 : index
    %c0_17 = arith.constant 0 : index
    %30 = vector.load %arg1[%c0_15, %c0_16, %c0_17] : memref<1x4x128xf32, #tpu.memory_space<vmem>>, vector<1x4x128xf32>
    %31 = vector.broadcast %26 : vector<1x4x1xf32> to vector<1x4x128xf32>
    %32 = arith.mulf %30, %31 : vector<1x4x128xf32>
    %33 = vector.broadcast %29 : vector<1x4x1xf32> to vector<1x4x128xf32>
    %34 = arith.addf %32, %33 : vector<1x4x128xf32>
    %c0_18 = arith.constant 0 : index
    %c0_19 = arith.constant 0 : index
    %c0_20 = arith.constant 0 : index
    %35 = vector.load %arg3[%c0_18, %c0_19, %c0_20] : memref<1x4x128xf32, #tpu.memory_space<vmem>>, vector<1x4x128xf32>
    tpu.vector_store %arg3[%c0_18, %c0_19, %c0_20], %34 {strides = array<i32>} : memref<1x4x128xf32, #tpu.memory_space<vmem>>, vector<1x4x128xf32>,
    return
  }
  func.func @transform_0(%arg0: i32) -> (i32, i32, i32) {
    %c0_i32 = arith.constant 0 : i32
    %c0_i32_0 = arith.constant 0 : i32
    %c0_i32_1 = arith.constant 0 : i32
    return %arg0, %c0_i32, %c0_i32_0 : i32, i32, i32
  }
  func.func @transform_1(%arg0: i32) -> (i32, i32, i32) {
    %c0_i32 = arith.constant 0 : i32
    %c0_i32_0 = arith.constant 0 : i32
    %c0_i32_1 = arith.constant 0 : i32
    return %arg0, %c0_i32, %c0_i32_0 : i32, i32, i32
  }
  func.func @transform_2(%arg0: i32) -> (i32, i32, i32) {
    %c0_i32 = arith.constant 0 : i32
    %c0_i32_0 = arith.constant 0 : i32
    %c0_i32_1 = arith.constant 0 : i32
    return %arg0, %c0_i32, %c0_i32_0 : i32, i32, i32
  }
}

</mosaic_0001>

<bundles_post_ra>
// kernel: tpu_custom_call.1
= control target key start
LH: loop header
LB: loop body
LE: loop exit
PB: predicated region body
PF: predicated region fallthrough
CT: control target
= control target key end

     0   :  { %7 = vsyncpa [#allocation3], 0  ;;  %s539_s0 = inlined_call_operand.vmem [shape: f32[4,4,128], index: 0, kind: input, shape index: {}]   ;;  %s540_s1 = inlined_call_operand.vmem [shape: f32[4,4,2], index: 1, kind: input, shape index: {}]   ;;  %s541_s2 = inlined_call_operand.hbm [shape: f32[4,4,128], index: 2, kind: output, shape index: {}]  }
   0x1   :  { %9 = vsyncpa [#allocation3 + $0x1], 0  ;;  %s429_s9 = smov 0   ;;  %s431_s10 = smov 0  }
   0x2   :  { %s433_s11 = smov 0   ;;  %s435_s12 = smov 0  }
   0x3 LB: > { %s450_s13 = sadd.s32 4294967295, %s408_s12   ;;  %s289_s14 = sadd.s32 4294967294, %s408_s12   ;;  %s408_s12 = sphi %s435_s12, %s547_s12   ;;  %s404_s11 = sphi %s433_s11, %s546_s11   ;;  %s400_s10 = sphi %s431_s10, %s545_s10   ;;  %s396_s9 = sphi %s429_s9, %s544_s9  }
   0x4   : > { %s454_s15 = sadd.s32 1, %s408_s12   ;;  %s74_s16 = sadd.s32 1, %s404_s11 }
   0x5   : > { %s71_s17 = ssub.s32 %s408_s12, %s454_s15  ;;  %p84_p0 = scmp.ne.s32.totalorder %s404_s11, %s400_s10 }
   0x6   : > { %p72_p1 = scmp.eq.s32.totalorder %s71_s17, 0  ;;  %p85_p2 = scmp.eq.s32.totalorder %s450_s13, 3 }
   0x7   : > { %p90_p3 = scmp.ne.s32.totalorder %s400_s10, %s396_s9  ;;  %p91_p4 = scmp.eq.s32.totalorder %s289_s14, 3 }
   0x8   : > { %s465_s18 = scalar_select %p72_p1, %s404_s11, %s74_s16  }
   0x9   : > { %p467_p5 = por %p85_p2, %p84_p0  ;;  %p471_p6 = por %p91_p4, %p90_p3 }
   0xa   : > { %p292_p7 = scmp.ge.s32.totalorder %s408_s12, 1  ;;  %p123_p8 = scmp.lt.s32.totalorder %s408_s12, 5 }
   0xc   : > { %p124_p9 = pnand %p292_p7, %p123_p8 }
   0xd   : > { %p148_p10 = scmp.lt.s32.totalorder (!%p124_p9), %s450_s13, 3  ;;  %vm157_vm0 = vcmask (!%p124_p9), 1043456   ;;  %v410_v19 = vmov (!%p124_p9), 0   ;;  %v411_v24 = vmov (!%p124_p9), 1   ;;  %s412_s29 = smov (!%p124_p9), 1  }
   0xe   : > { %127 = sbr.rel (%p124_p9) target bundleno = 624 (0x270), region = 28  ;;  %342 = vset.pattern.permute.xlu1 (!%p124_p9), %v410_v19  ;;  %343 = vset.pattern.permute.xlu0 (!%p124_p9), %v411_v24  ;;  %s145_s30 = sand.u32 (!%p124_p9), 1, %s400_s10  }
   0xf   : > { %s293_s3 = sshll.u32 (!%p124_p9), %s145_s30, 2  ;;  %s297_s4 = sshll.u32 (!%p124_p9), %s450_s13, 6 }
  0x10   : > { %s147_s5 = scalar_lea.vmem (!%p124_p9), [#allocation2], %s293_s3  ;;  %s497_s14 = scalar_lea.hbm (!%p124_p9), %s541_s2, %s297_s4 }
  0x11   : > { %s218_s6 = sshll.u32 (!%p124_p9), %s147_s5, 4  ;;  %s205_s16 = scalar_lea.sflag (!%p124_p9), [#allocation3], %s145_s30  ;;  %s499_s6 = int_to_ptr.vmem [resolvable:$true] %s218_s6 }
  0x12   : > { %s346_s17 = scalar_lea.vmem (!%p124_p9), %s499_s6, 64 }
  0x13   : > { %p347_p11 = scmp.ne.s32.totalorder (!%p124_p9), %s499_s6, %s346_s17 }
  0x15   : > { %s479_s21 = scalar_select %p148_p10, %s450_s13, 3 }
  0x16   : > { %p348_p12 = pnand %p347_p11, %p467_p5  ;;  %s413_s13 = smov [#allocation2]  }
  0x17   : > { %s294_s22 = sshll.u32 %s479_s21, 2  ;;  %s350_s21 = sshll.u32 %s413_s13, 4  ;;  %s351_s21 = int_to_ptr.vmem [resolvable:$false] %s350_s21 }
  0x18   : > { %s151_s25 = scalar_lea.vmem %s539_s0, %s294_s22  ;;  %s155_s28 = scalar_lea.vmem %s540_s1, %s294_s22 }
  0x19   : > { %v156_v0 = vld [vmem:[%s151_s25] sm:$0xf]  ;;  %p349_p13 = pneg %p348_p12  ;;  %s352_s22 = scalar_lea.vmem %s351_s21, 128 }
  0x1a   : > { %v158_v1 = vsel %vm157_vm0, %v156_v0, 0.0  ;;  %v183_v25 = vld [vmem:[%s155_s28] sm:$0xf]  ;;  %p353_p0 = scmp.lt.s32.totalorder %s499_s6, %s351_s21  ;;  %p354_p1 = scmp.lt.s32.totalorder %s352_s22, %s346_s17 }
  0x1b   : > { %v159_v2 = vrot.slane %v158_v1, 4 }
  0x1c   : > { %p355_p2 = por %p354_p1, %p353_p0 }
  0x1d   : > { %v160_v3 = vadd.f32 %v159_v2, %v158_v1 }
  0x1e   : > { %p356_p3 = pnand %p355_p2, %p349_p13 }
  0x1f   : > { %v161_v4 = vrot.slane %v160_v3, 2 }
  0x21   : > { %v162_v5 = vadd.f32 %v161_v4, %v160_v3 }
  0x23   : > { %v163_v6 = vrot.slane %v162_v5, 1 }
  0x25   : > { %v164_v7 = vadd.f32 %v163_v6, %v162_v5 }
  0x27   : > { %165 = vadd.xlane.f32.xlu0 %v164_v7 }
  0xb4   : > { %v166_v8 = vpop.xlane.xlu0 %165 }
  0xb5   : > { %v167_v9 = vmul.f32 0.001953125, %v166_v8 }
  0xb7   : > { %v168_v10 = vsub.f32 %v156_v0, %v167_v9 }
  0xb9   : > { %v169_v11 = vmul.f32 %v168_v10, %v168_v10 }
  0xbb   : > { %v170_v12 = vsel %vm157_vm0, %v169_v11, 0.0 }
  0xbc   : > { %v171_v13 = vrot.slane %v170_v12, 4 }
  0xbe   : > { %v172_v14 = vadd.f32 %v171_v13, %v170_v12 }
  0xc0   : > { %v173_v15 = vrot.slane %v172_v14, 2 }
  0xc2   : > { %v174_v16 = vadd.f32 %v173_v15, %v172_v14 }
  0xc4   : > { %v175_v17 = vrot.slane %v174_v16, 1 }
  0xc6   : > { %v176_v18 = vadd.f32 %v175_v17, %v174_v16 }
  0xc8   : > { %177 = vadd.xlane.f32.xlu0 %v176_v18 }
 0x155   : > { %v178_v20 = vpop.xlane.xlu0 %177 }
 0x156   : > { %v179_v21 = vmax.f32 %v178_v20, 0.0 }
 0x158   : > { %v180_v22 = vmul.f32 0.0019569471, %v179_v21 }
 0x15a   : > { %v181_v23 = vadd.f32 1e-05, %v180_v22 }
 0x15c   : > { %344 = vrsqrt.f32 %v181_v23 }
 0x166   : > { %v345_v26 = vpop.eup %344 }
 0x167   : > { %v184_v27 = vmul.f32 %v345_v26, %v183_v25 }
 0x169   : > { %v185_v28 = vmul.f32 %v184_v27, %v167_v9 }
 0x16b   : > { %187 = vrot.lane.b32.xlu1 %v185_v28, %s412_s29 }
 0x16f   : > { %193 = vperm.xlu1 %342, %v184_v27  }
 0x1dd   : > { %v188_v29 = vpop.permute.xlu1 %187 }
 0x1de   : > { %v190_v30 = vsub.f32 %v183_v25, %v188_v29 }
 0x1e0   : > { %199 = vperm.xlu0 %343, %v190_v30  }
 0x1ee   : > { %v194_v31 = vpop.permute.xlu1 %193 }
 0x1ef   : > { %v196_v32 = vmul.f32 %v194_v31, %v156_v0 }
 0x25f   : > { %v200_v33 = vpop.permute.xlu0 %199 }
 0x260   : > { %v202_v34 = vadd.f32 %v200_v33, %v196_v32 }
 0x262   : > { %203 = vst [vmem:[%s147_s5] sm:$0xf] %v202_v34 }
 0x263   : > { %359 = shalt.err (!%p356_p3)
}
 0x264   : > { %s360_s23 = scalar_lea.hbm %s497_s14, 64  ;;  %s364_s26 = scalar_lea.hbm %s541_s2, 256 }
 0x265   : > { %p361_p4 = scmp.ne.s32.totalorder %s497_s14, %s360_s23  ;;  %p365_p9 = scmp.lt.u32.totalorder %s497_s14, %s541_s2 }
 0x266   : > { %p366_p10 = scmp.lt.u32.totalorder %s364_s26, %s360_s23  ;;  %p368_p12 = scmp.lt.u32.totalorder %s360_s23, %s497_s14 }
 0x267   : > { %p362_p7 = pnand %p361_p4, %p467_p5 }
 0x268   : > { %p367_p11 = por %p366_p10, %p365_p9 }
 0x269   : > { %p363_p8 = pneg %p362_p7 }
 0x26a   : > { %p369_p13 = por %p368_p12, %p367_p11 }
 0x26c   : > { %p370_p0 = pnand %p369_p13, %p363_p8 }
 0x26e   : > { %373 = shalt.err (!%p370_p0)
}
 0x26f   : > { %300 = dma.vmem_to_hbm [thread:$0]  (%p467_p5), %s499_s6, 64, %s497_s14, %s205_s16  }
 0x270 PF: > { %p306_p1 = scmp.ge.s32.totalorder %s408_s12, 2  ;;  %s230_s29 = sand.u32 1, %s396_s9  }
 0x271   : > { %s231_s30 = scalar_lea.sflag [#allocation3], %s230_s29 }
 0x272   : > { %p303_p2 = pnand %p306_p1, %p471_p6 }
 0x274   : > { %391 = dma.done.wait (!%p303_p2), %s231_s30, 64  }
 0x275   : > { %393 = vsyncadd (!%p303_p2), %s231_s30, 4294967232  ;;  %p12_p3 = scmp.ge.s32.totalorder %s454_s15, 6   ;;  %s544_s9 = smov %s400_s10 }
 0x276   : > { %s545_s10 = smov %s404_s11  ;;  %s546_s11 = smov %s465_s18 }
 0x277   : > { %s547_s12 = smov %s454_s15  ;;  %14 = sbr.rel (!%p12_p3) target bundleno = 3 (0x3), region = 66 }
 0x27e   :  { %236 = vsyncpa [#allocation3], 1 }
 0x27f   :  { %238 = vsyncpa [#allocation3 + $0x1], 1 }

</bundles_post_ra>
